<compile_context>
chip_gen: v6e
topology: v6e:2x2x1
jax: 0.10.0
libtpu: 0.0.40
codegen_flags: <defaults>
</compile_context>

<pallas_src>
import functools

import jax
import jax.numpy as jnp
from jax.experimental import pallas as pl
from jax.experimental.pallas import tpu as pltpu


def _round_up(x, m):
    return (x + m - 1) // m * m


def _pick_row_tile(C):
    # ~1 MiB of bf16 per row-tile buffer, clamped to [256, 4096], multiple of 256.
    tr = (1 << 20) // (2 * C)
    return max(256, min(4096, (tr // 256) * 256))


def _pick_pool_tile(C):
    # ~2 MiB of bf16 for the (9, tr, C) maxpool input block, multiple of 128.
    tr = (2 << 20) // (9 * 2 * C)
    return max(128, min(1024, (tr // 128) * 128))


# ----------------------------------------------------------------------------
# Conv GEMM with fused BN statistics (bf16 MXU, f32 accumulator, bf16 output)
# ----------------------------------------------------------------------------

def _conv_gemm_kernel(a_ref, b_ref, o_ref, sum_ref, sq_ref, acc_ref,
                      *, valid_m, tm, k_chunk):
    K = a_ref.shape[1]
    # K-chunked MXU accumulation into the f32 VMEM scratch accumulator.
    for t, k0 in enumerate(range(0, K, k_chunk)):
        kcw = min(k_chunk, K - k0)
        part = jnp.dot(a_ref[:, k0:k0 + kcw], b_ref[k0:k0 + kcw, :],
                       preferred_element_type=jnp.float32)
        if t == 0:
            acc_ref[...] = part
        else:
            acc_ref[...] += part

    acc = acc_ref[...]
    o_ref[...] = acc.astype(o_ref.dtype)

    # Fused BN stats: mask out rows past the true M (ragged boundary block),
    # then reduce over the tile's rows.  Final cross-tile reduction is tiny
    # and done in plain JAX.
    rows = jax.lax.broadcasted_iota(jnp.int32, acc.shape, 0)
    valid = valid_m - pl.program_id(0) * tm
    accm = jnp.where(rows < valid, acc, 0.0)
    sum_ref[...] = jnp.sum(accm, axis=0, keepdims=True).reshape(1, 1, -1)
    sq_ref[...] = jnp.sum(accm * accm, axis=0, keepdims=True).reshape(1, 1, -1)


def _gemm_tiles(M, N):
    # Lane-dense N tile.
    TN = min(N, 256) if N % 128 == 0 else N
    TM = 256 if M >= 256 else M
    # Ensure >= 2 blocks on the parallel grid where possible (v7x: 2 TCs/chip).
    if pl.cdiv(M, TM) * pl.cdiv(N, TN) < 2:
        if M >= 16:
            TM = _round_up(pl.cdiv(M, 2), 8)
        elif N % 256 == 0:
            TN = N // 2
    return TM, TN


def conv_gemm_stats(a, b):
    """(M, K) bf16 @ (K, N) bf16 -> bf16 (M, N) plus per-channel sum / sumsq."""
    M, K = a.shape
    K2, N = b.shape
    assert K == K2

    TM, TN = _gemm_tiles(M, N)
    mt, nt = pl.cdiv(M, TM), pl.cdiv(N, TN)
    k_chunk = min(K, 512)

    a = a.astype(jnp.bfloat16)
    b = b.astype(jnp.bfloat16)

    # Actual per-step footprint (double-buffered bf16 inputs/outputs, f32 acc)
    # plus headroom for compiler scratch/spills.
    vmem_bytes = (2 * (TM * K + K * TN) * 2
                  + 2 * TM * TN * 2
                  + 2 * 2 * 2 * TN * 4
                  + TM * TN * 4
                  + (12 << 20))
    vmem_bytes = min(vmem_bytes, 48 << 20)

    kernel = functools.partial(_conv_gemm_kernel, valid_m=M, tm=TM,
                               k_chunk=k_chunk)

    y, s, sq = pl.pallas_call(
        kernel,
        out_shape=(jax.ShapeDtypeStruct((M, N), jnp.bfloat16),
                   jax.ShapeDtypeStruct((mt, 1, N), jnp.float32),
                   jax.ShapeDtypeStruct((mt, 1, N), jnp.float32)),
        grid=(mt, nt),
        in_specs=[pl.BlockSpec((TM, K), lambda i, j: (i, 0)),
                  pl.BlockSpec((K, TN), lambda i, j: (0, j))],
        out_specs=(pl.BlockSpec((TM, TN), lambda i, j: (i, j)),
                   pl.BlockSpec((1, 1, TN), lambda i, j: (i, 0, j)),
                   pl.BlockSpec((1, 1, TN), lambda i, j: (i, 0, j))),
        scratch_shapes=[pltpu.VMEM((TM, TN), jnp.float32)],
        compiler_params=pltpu.CompilerParams(
            dimension_semantics=("parallel", "parallel"),
            vmem_limit_bytes=vmem_bytes),
        cost_estimate=pl.CostEstimate(
            flops=2 * M * N * K,
            transcendentals=0,
            bytes_accessed=M * K * 2 + K * N * 2 + M * N * 2),
    )(a, b)

    return y, s.sum(axis=(0, 1)), sq.sum(axis=(0, 1))


# ----------------------------------------------------------------------------
# BatchNorm apply (train-mode batch stats, fused residual add + ReLU)
# ----------------------------------------------------------------------------

def _bn_apply_kernel(x_ref, scale_ref, shift_ref, o_ref, *, relu):
    y = x_ref[...].astype(jnp.float32) * scale_ref[...] + shift_ref[...]
    if relu:
        y = jnp.maximum(y, 0.0)
    o_ref[...] = y.astype(o_ref.dtype)


def _bn_apply_res_kernel(x_ref, res_ref, scale_ref, shift_ref, o_ref, *, relu):
    y = (x_ref[...].astype(jnp.float32) * scale_ref[...] + shift_ref[...]
         + res_ref[...].astype(jnp.float32))
    if relu:
        y = jnp.maximum(y, 0.0)
    o_ref[...] = y.astype(o_ref.dtype)


def batchnorm_apply(x_nhwc, ch_sum, ch_sq, gamma, beta, relu, residual=None):
    """Train-mode BN using per-channel sums fused into the conv GEMM."""
    N, H, W, C = x_nhwc.shape
    rows = N * H * W
    n = jnp.float32(rows)

    mean = ch_sum / n
    # TODO(synk): shifted-moment variance in f32 (clamped at 0); switch to a
    #             centered second pass if activations ever get mean >> std.
    var = jnp.maximum(ch_sq / n - mean * mean, 0.0)
    inv = jax.lax.rsqrt(var + 1e-5)
    scale = (gamma * inv).reshape(1, C).astype(jnp.float32)
    shift = (beta - mean * gamma * inv).reshape(1, C).astype(jnp.float32)

    x2 = x_nhwc.reshape(rows, C)
    tr = min(_pick_row_tile(C), rows)
    grid = (pl.cdiv(rows, tr),)

    if residual is None:
        kernel = functools.partial(_bn_apply_kernel, relu=relu)
        ins = (x2, scale, shift)
        in_specs = [pl.BlockSpec((tr, C), lambda i: (i, 0)),
                    pl.BlockSpec((1, C), lambda i: (0, 0)),
                    pl.BlockSpec((1, C), lambda i: (0, 0))]
    else:
        r2 = residual.reshape(rows, C)
        kernel = functools.partial(_bn_apply_res_kernel, relu=relu)
        ins = (x2, r2, scale, shift)
        in_specs = [pl.BlockSpec((tr, C), lambda i: (i, 0)),
                    pl.BlockSpec((tr, C), lambda i: (i, 0)),
                    pl.BlockSpec((1, C), lambda i: (0, 0)),
                    pl.BlockSpec((1, C), lambda i: (0, 0))]

    y = pl.pallas_call(
        kernel,
        out_shape=jax.ShapeDtypeStruct((rows, C), jnp.bfloat16),
        grid=grid,
        in_specs=in_specs,
        out_specs=pl.BlockSpec((tr, C), lambda i: (i, 0)),
        compiler_params=pltpu.CompilerParams(
            dimension_semantics=("parallel",)),
    )(*ins)

    return y.reshape(N, H, W, C)


# ----------------------------------------------------------------------------
# Pooling kernels
# ----------------------------------------------------------------------------

def _max9_kernel(x_ref, o_ref):
    o_ref[...] = jnp.max(x_ref[...].astype(jnp.float32), axis=0).astype(o_ref.dtype)


def _avgpool_kernel(x_ref, o_ref):
    o_ref[...] = jnp.mean(x_ref[...].astype(jnp.float32), axis=1)


def maxpool3x3s2p1(x_nhwc):
    N, H, W, C = x_nhwc.shape
    neg = float(jnp.finfo(jnp.bfloat16).min)
    xp = jnp.pad(x_nhwc, ((0, 0), (1, 1), (1, 1), (0, 0)), constant_values=neg)
    OH = (H + 2 - 3) // 2 + 1
    OW = (W + 2 - 3) // 2 + 1
    M = N * OH * OW
    # TODO(synk): the (9, M, C) stack still round-trips HBM; a windowed-read
    #             kernel over the padded NHWC tensor would avoid it.
    cols = [xp[:, i:i + 2 * (OH - 1) + 1:2,
               j:j + 2 * (OW - 1) + 1:2, :].reshape(1, M, C)
            for i in range(3) for j in range(3)]
    stacked = jnp.concatenate(cols, axis=0)

    tr = min(_pick_pool_tile(C), M)
    out = pl.pallas_call(
        _max9_kernel,
        out_shape=jax.ShapeDtypeStruct((M, C), jnp.bfloat16),
        grid=(pl.cdiv(M, tr),),
        in_specs=[pl.BlockSpec((9, tr, C), lambda i: (0, i, 0))],
        out_specs=pl.BlockSpec((tr, C), lambda i: (i, 0)),
        compiler_params=pltpu.CompilerParams(
            dimension_semantics=("parallel",)),
    )(stacked)
    return out.reshape(N, OH, OW, C)


def global_avgpool(x_nhwc):
    N, H, W, C = x_nhwc.shape
    x3 = x_nhwc.reshape(N, H * W, C)
    return pl.pallas_call(
        _avgpool_kernel,
        out_shape=jax.ShapeDtypeStruct((N, C), jnp.float32),
        grid=(1,),
        in_specs=[pl.BlockSpec((N, H * W, C), lambda i: (0, 0, 0))],
        out_specs=pl.BlockSpec((N, C), lambda i: (0, 0)),
    )(x3)


# ----------------------------------------------------------------------------
# Conv wrapper (im2col glue + Pallas GEMM w/ fused BN stats)
# ----------------------------------------------------------------------------

def _im2col(x_nhwc, kh, kw, stride, pad):
    N, H, W, C = x_nhwc.shape
    if pad > 0:
        x_nhwc = jnp.pad(x_nhwc, ((0, 0), (pad, pad), (pad, pad), (0, 0)))
    OH = (H + 2 * pad - kh) // stride + 1
    OW = (W + 2 * pad - kw) // stride + 1
    cols = []
    for i in range(kh):
        for j in range(kw):
            cols.append(x_nhwc[:,
                               i:i + stride * (OH - 1) + 1:stride,
                               j:j + stride * (OW - 1) + 1:stride, :])
    patches = jnp.concatenate(cols, axis=-1)          # (N, OH, OW, KH*KW*C)
    return patches.reshape(N * OH * OW, kh * kw * C), (N, OH, OW)


def conv2d_stats(x_nhwc, w2d, kh, kw, stride, pad):
    """bf16 conv via im2col + Pallas GEMM; returns (y_nhwc bf16, sum, sumsq)."""
    a, (N, OH, OW) = _im2col(x_nhwc, kh, kw, stride, pad)
    OC = w2d.shape[1]
    y, s, sq = conv_gemm_stats(a, w2d)
    return y.reshape(N, OH, OW, OC), s, sq


def prep_conv_weight(w_oihw):
    """OIHW f32 -> (KH*KW*IC, OC) bf16, done once at init time."""
    OC, IC, KH, KW = w_oihw.shape
    return jnp.transpose(w_oihw, (2, 3, 1, 0)).reshape(KH * KW * IC, OC).astype(
        jnp.bfloat16)


# ----------------------------------------------------------------------------
# ResNet-18 backbone (FeatureStats.forward)
# ----------------------------------------------------------------------------

def init_params(key):
    keys = iter(jax.random.split(key, 64))

    def w(shape):
        return prep_conv_weight(
            jax.random.normal(next(keys), shape, jnp.float32) * 0.05)

    params = {
        "conv1": w((64, 3, 7, 7)),
        "bn1_g": jnp.ones((64,), jnp.float32),
        "bn1_b": jnp.zeros((64,), jnp.float32),
    }
    layers = []
    in_ch = 64
    for out_ch, first_stride in [(64, 1), (128, 2), (256, 2), (512, 2)]:
        blocks = []
        for bi in range(2):
            s = first_stride if bi == 0 else 1
            blk = {
                "stride": s,
                "conv1": w((out_ch, in_ch, 3, 3)),
                "bn1_g": jnp.ones((out_ch,), jnp.float32),
                "bn1_b": jnp.zeros((out_ch,), jnp.float32),
                "conv2": w((out_ch, out_ch, 3, 3)),
                "bn2_g": jnp.ones((out_ch,), jnp.float32),
                "bn2_b": jnp.zeros((out_ch,), jnp.float32),
            }
            if s != 1 or in_ch != out_ch:
                blk["down_conv"] = w((out_ch, in_ch, 1, 1))
                blk["down_g"] = jnp.ones((out_ch,), jnp.float32)
                blk["down_b"] = jnp.zeros((out_ch,), jnp.float32)
            blocks.append(blk)
            in_ch = out_ch
        layers.append(blocks)
    params["layers"] = layers
    return params


def feature_stats_forward(x_nchw, params):
    # NCHW (PyTorch) -> NHWC (internal); activations in bf16 end-to-end.
    x = jnp.transpose(x_nchw, (0, 2, 3, 1)).astype(jnp.bfloat16)

    # stem: conv7x7 s2 p3 -> BN+ReLU -> maxpool 3x3 s2 p1
    y, s, sq = conv2d_stats(x, params["conv1"], 7, 7, stride=2, pad=3)
    x = batchnorm_apply(y, s, sq, params["bn1_g"], params["bn1_b"], relu=True)
    x = maxpool3x3s2p1(x)

    # layer1..layer4 (BasicBlocks); residual add + ReLU fused into bn2.
    for layer in params["layers"]:
        for blk in layer:
            st = blk["stride"]
            identity = x
            y, s, sq = conv2d_stats(x, blk["conv1"], 3, 3, stride=st, pad=1)
            out = batchnorm_apply(y, s, sq, blk["bn1_g"], blk["bn1_b"],
                                  relu=True)
            y, s, sq = conv2d_stats(out, blk["conv2"], 3, 3, stride=1, pad=1)
            if "down_conv" in blk:
                yd, sd, sqd = conv2d_stats(identity, blk["down_conv"], 1, 1,
                                           stride=st, pad=0)
                identity = batchnorm_apply(yd, sd, sqd, blk["down_g"],
                                           blk["down_b"], relu=False)
            x = batchnorm_apply(y, s, sq, blk["bn2_g"], blk["bn2_b"],
                                relu=True, residual=identity)

    # adaptive avgpool to 1x1 + flatten -> (N, 512) in f32
    return global_avgpool(x)


if __name__ == "__main__":
    key = jax.random.PRNGKey(0)
    pkey, xkey = jax.random.split(key)
    params = init_params(pkey)

    # Small NCHW input consistent with an ImageNet-style backbone (/32 downsample).
    x = jax.random.normal(xkey, (2, 3, 32, 32), jnp.float32)

    out = feature_stats_forward(x, params)
    out = jax.block_until_ready(out)

    assert out.shape == (2, 512), out.shape
    assert bool(jnp.all(jnp.isfinite(out)))
    print("KERNEL_OK")
</pallas_src>

<mosaic_0001>
module attributes {stable_mosaic.version = 11 : i64} {
  func.func @_conv_gemm_kernel(%arg0: i32, %arg1: i32, %arg2: memref<256x147xbf16, #tpu.memory_space<vmem>>, %arg3: memref<147x64xbf16, #tpu.memory_space<vmem>>, %arg4: memref<256x64xbf16, #tpu.memory_space<vmem>>, %arg5: memref<1x1x64xf32, #tpu.memory_space<vmem>>, %arg6: memref<1x1x64xf32, #tpu.memory_space<vmem>>, %arg7: memref<256x64xf32, #tpu.memory_space<vmem>>) attributes {dimension_semantics = [#tpu.dimension_semantics<parallel>, #tpu.dimension_semantics<parallel>], iteration_bounds = array<i64: 2, 1>, scalar_prefetch = 0 : i64, scratch_operands = 1 : i64, tpu.core_type = #tpu.core_type<tc>, window_params = [{transform_indices = @transform_0, window_bounds = array<i64: 256, 147>}, {transform_indices = @transform_1, window_bounds = array<i64: 147, 64>}, {transform_indices = @transform_2, window_bounds = array<i64: 256, 64>}, {transform_indices = @transform_3, window_bounds = array<i64: 1, 1, 64>}, {transform_indices = @transform_4, window_bounds = array<i64: 1, 1, 64>}]} {
    %c0 = arith.constant 0 : index
    %c0_0 = arith.constant 0 : index
    %0 = vector.load %arg2[%c0, %c0_0] : memref<256x147xbf16, #tpu.memory_space<vmem>>, vector<256x147xbf16>
    %c0_1 = arith.constant 0 : index
    %c0_2 = arith.constant 0 : index
    %1 = vector.load %arg3[%c0_1, %c0_2] : memref<147x64xbf16, #tpu.memory_space<vmem>>, vector<147x64xbf16>
    %cst = arith.constant dense<0.000000e+00> : vector<256x64xf32>
    %2 = tpu.matmul %0, %1, %cst {dimension_numbers = #tpu.dot_dimension_numbers<[1], [0], [0], [1], [0, 0, 1, 1], [], []>} : vector<256x147xbf16>, vector<147x64xbf16>, vector<256x64xf32> -> vector<256x64xf32>
    %c0_3 = arith.constant 0 : index
    %c0_4 = arith.constant 0 : index
    %3 = vector.load %arg7[%c0_3, %c0_4] : memref<256x64xf32, #tpu.memory_space<vmem>>, vector<256x64xf32>
    tpu.vector_store %arg7[%c0_3, %c0_4], %2 {strides = array<i32>} : memref<256x64xf32, #tpu.memory_space<vmem>>, vector<256x64xf32>,
    %c0_5 = arith.constant 0 : index
    %c0_6 = arith.constant 0 : index
    %4 = vector.load %arg7[%c0_5, %c0_6] : memref<256x64xf32, #tpu.memory_space<vmem>>, vector<256x64xf32>
    %5 = arith.truncf %4 : vector<256x64xf32> to vector<256x64xbf16>
    %c0_7 = arith.constant 0 : index
    %c0_8 = arith.constant 0 : index
    %6 = vector.load %arg4[%c0_7, %c0_8] : memref<256x64xbf16, #tpu.memory_space<vmem>>, vector<256x64xbf16>
    tpu.vector_store %arg4[%c0_7, %c0_8], %5 {strides = array<i32>} : memref<256x64xbf16, #tpu.memory_space<vmem>>, vector<256x64xbf16>,
    %7 = tpu.iota {dimensions = array<i32: 0>} : vector<256x64xi32>
    %c256_i32 = arith.constant 256 : i32
    %8 = arith.muli %arg0, %c256_i32 : i32
    %c512_i32 = arith.constant 512 : i32
    %9 = arith.subi %c512_i32, %8 : i32
    %10 = vector.broadcast %9 : i32 to vector<256x64xi32>
    %11 = arith.cmpi slt, %7, %10 : vector<256x64xi32>
    %cst_9 = arith.constant 0.000000e+00 : f32
    %12 = vector.broadcast %cst_9 : f32 to vector<256x64xf32>
    %13 = arith.select %11, %4, %12 : vector<256x64xi1>, vector<256x64xf32>
    %cst_10 = arith.constant dense<0.000000e+00> : vector<64xf32>
    %14 = vector.multi_reduction <add>, %13, %cst_10 [0] : vector<256x64xf32> to vector<64xf32>
    %15 = vector.shape_cast %14 : vector<64xf32> to vector<1x64xf32>
    %16 = vector.shape_cast %15 : vector<1x64xf32> to vector<1x1x64xf32>
    %c0_11 = arith.constant 0 : index
    %c0_12 = arith.constant 0 : index
    %c0_13 = arith.constant 0 : index
    %17 = vector.load %arg5[%c0_11, %c0_12, %c0_13] : memref<1x1x64xf32, #tpu.memory_space<vmem>>, vector<1x1x64xf32>
    tpu.vector_store %arg5[%c0_11, %c0_12, %c0_13], %16 {strides = array<i32>} : memref<1x1x64xf32, #tpu.memory_space<vmem>>, vector<1x1x64xf32>,
    %18 = arith.mulf %13, %13 : vector<256x64xf32>
    %cst_14 = arith.constant dense<0.000000e+00> : vector<64xf32>
    %19 = vector.multi_reduction <add>, %18, %cst_14 [0] : vector<256x64xf32> to vector<64xf32>
    %20 = vector.shape_cast %19 : vector<64xf32> to vector<1x64xf32>
    %21 = vector.shape_cast %20 : vector<1x64xf32> to vector<1x1x64xf32>
    %c0_15 = arith.constant 0 : index
    %c0_16 = arith.constant 0 : index
    %c0_17 = arith.constant 0 : index
    %22 = vector.load %arg6[%c0_15, %c0_16, %c0_17] : memref<1x1x64xf32, #tpu.memory_space<vmem>>, vector<1x1x64xf32>
    tpu.vector_store %arg6[%c0_15, %c0_16, %c0_17], %21 {strides = array<i32>} : memref<1x1x64xf32, #tpu.memory_space<vmem>>, vector<1x1x64xf32>,
    return
  }
  func.func @transform_0(%arg0: i32, %arg1: i32) -> (i32, i32) {
    %c0_i32 = arith.constant 0 : i32
    %c0_i32_0 = arith.constant 0 : i32
    return %arg0, %c0_i32 : i32, i32
  }
  func.func @transform_1(%arg0: i32, %arg1: i32) -> (i32, i32) {
    %c0_i32 = arith.constant 0 : i32
    %c0_i32_0 = arith.constant 0 : i32
    return %c0_i32, %arg1 : i32, i32
  }
  func.func @transform_2(%arg0: i32, %arg1: i32) -> (i32, i32) {
    %c0_i32 = arith.constant 0 : i32
    return %arg0, %arg1 : i32, i32
  }
  func.func @transform_3(%arg0: i32, %arg1: i32) -> (i32, i32, i32) {
    %c0_i32 = arith.constant 0 : i32
    %c0_i32_0 = arith.constant 0 : i32
    return %arg0, %c0_i32, %arg1 : i32, i32, i32
  }
  func.func @transform_4(%arg0: i32, %arg1: i32) -> (i32, i32, i32) {
    %c0_i32 = arith.constant 0 : i32
    %c0_i32_0 = arith.constant 0 : i32
    return %arg0, %c0_i32, %arg1 : i32, i32, i32
  }
}

</mosaic_0001>

<bundles_post_ra>
// kernel: tpu_custom_call.1
= control target key start
LH: loop header
LB: loop body
LE: loop exit
PB: predicated region body
PF: predicated region fallthrough
CT: control target
= control target key end

     0   :  { %10 = vsyncpa [#allocation4], 0  ;;  %s2459_s0 = inlined_call_operand.vmem [shape: bf16[512,147], index: 0, kind: input, shape index: {}]   ;;  %s2460_s1 = inlined_call_operand.vmem [shape: bf16[147,64], index: 1, kind: input, shape index: {}]   ;;  %s2461_s2 = inlined_call_operand.vmem [shape: bf16[512,64], index: 2, kind: output, shape index: {0}]   ;;  %s2462_s3 = inlined_call_operand.hbm [shape: f32[2,1,64], index: 3, kind: output, shape index: {1}]   ;;  %s2463_s4 = inlined_call_operand.hbm [shape: f32[2,1,64], index: 4, kind: output, shape index: {2}]  }
   0x1   :  { %12 = vsyncpa [#allocation4 + $0x1], 0 }
   0x2   :  { %13 = vsyncpa [#allocation6], 0 }
   0x3   :  { %15 = vsyncpa [#allocation6 + $0x1], 0  ;;  %s1833_s15 = smov 0   ;;  %s1835_s16 = smov 0  }
   0x4   :  { %s1837_s17 = smov 0   ;;  %s1839_s18 = smov 0  }
   0x5   :  { %s1841_s19 = smov 0   ;;  %s1843_s20 = smov 0  }
   0x6 LB: > { %s1417_s21 = sadd.s32 4294967295, %s1802_s20   ;;  %s1418_s22 = sadd.s32 4294967294, %s1802_s20   ;;  %s1802_s20 = sphi %s1843_s20, %s21_s20   ;;  %s1798_s19 = sphi %s1841_s19, %s2470_s19   ;;  %s1794_s18 = sphi %s1839_s18, %s2469_s18   ;;  %s1790_s17 = sphi %s1837_s17, %s2468_s17   ;;  %s1786_s16 = sphi %s1835_s16, %s2467_s16   ;;  %s1782_s15 = sphi %s1833_s15, %s2466_s15  }
   0x7   : > { %s33_s23 = sadd.s32 1, %s1798_s19  ;;  %s122_s24 = sadd.s32 1, %s1790_s17 }
   0x8   : > { %p35_p0 = scmp.ge.s32.totalorder %s33_s23, 2  ;;  %p132_p1 = scmp.ne.s32.totalorder %s1790_s17, %s1786_s16 }
   0x9   : > { %p133_p2 = scmp.eq.s32.totalorder %s1417_s21, 1  ;;  %p138_p3 = scmp.ne.s32.totalorder %s1786_s16, %s1782_s15 }
   0xa   : > { %s2472_s23 = smov (%p35_p0, %s33_s23), 0  ;;  %p139_p5 = scmp.eq.s32.totalorder %s1418_s22, 1 }
   0xb   : > { %p1873_p4 = por %p133_p2, %p132_p1  ;;  %s117_s26 = ssub.s32 %s1798_s19, %s2472_s23 }
   0xc   : > { %p1422_p6 = scmp.ge.s32.totalorder %s1802_s20, 1  ;;  %p120_p7 = scmp.eq.s32.totalorder %s117_s26, 0 }
   0xd   : > { %p1880_p8 = por %p139_p5, %p138_p3  ;;  %p202_p9 = scmp.lt.s32.totalorder %s1802_s20, 3 }
   0xe   : > { %s1886_s28 = scalar_select %p120_p7, %s1790_s17, %s122_s24  }
   0xf   : > { %p203_p10 = pnand %p1422_p6, %p202_p9 }
  0x10   : > { %s1423_s9 = sshll.u32 (!%p203_p10), %s1794_s18, 5  ;;  %s2370_s26 = sand.u32 (!%p203_p10), 1, %s1786_s16  }
  0x11   : > { %206 = sbr.rel (%p203_p10) target bundleno = 407 (0x197), region = 28  ;;  %p245_p11 = scmp.lt.s32.totalorder (!%p203_p10), %s1423_s9, 63 }
  0x12   : > { %s1519_s29 = sshll.u32 (!%p203_p10), %s1794_s18, 4  ;;  %s237_s30 = scalar_lea.vmem (!%p203_p10), [#allocation3], %s2370_s26 }
  0x13   : > { %s1263_s5 = sshll.u32 (!%p203_p10), %s237_s30, 4  ;;  %s243_s6 = scalar_lea.vmem (!%p203_p10), [#allocation5], %s2370_s26  ;;  %s2382_s5 = int_to_ptr.vmem [resolvable:$true] %s1263_s5 }
  0x14   : > { %s1277_s7 = sshll.u32 (!%p203_p10), %s243_s6, 4  ;;  %s2380_s11 = scalar_lea.hbm (!%p203_p10), %s2462_s3, %s1519_s29  ;;  %s2390_s7 = int_to_ptr.vmem [resolvable:$true] %s1277_s7 }
  0x15   : > { %s1242_s14 = scalar_lea.sflag (!%p203_p10), [#allocation4], %s2370_s26 }
  0x16   : > { %v1638_v0 = vld [vmem:[%s2460_s1 + $0x38] sm:$0xff]   ;;  %v1804_v1 = vmov 0   ;;  %v1639_v2 = vld [vmem:[%s2460_s1 + $0x30] sm:$0xff]   ;;  %v1640_v3 = vld [vmem:[%s2460_s1 + $0x28] sm:$0xff]   ;;  %s2474_s9 = smov (!%p245_p11, %s1423_s9), 63  ;;  %vm517_vm0 = vcmask 154624  }
  0x17   : > { %573 = vmatprep.subr.bf16.mxu0 %v1804_v1  ;;  %1556 = vmatprep.subr.bf16.mxu1 %v1804_v1  ;;  %v1641_v4 = vld [vmem:[%s2460_s1 + $0x20] sm:$0xff]   ;;  %s1523_s12 = sshll.u32 %s2474_s9, 3  ;;  %v1642_v5 = vld [vmem:[%s2460_s1 + $0x18] sm:$0xff]   ;;  %v1643_v7 = vld [vmem:[%s2460_s1 + $0x10] sm:$0xff]   ;;  %vm566_vm1 = vcmask 1040384   ;;  %vm567_vm2 = vcmask 1041408  }
  0x18   : > { %574 = vmatpush1.bf16.msra.mxu0 %v1638_v0  ;;  %1566 = vmatpush1.bf16.msra.mxu1 %v1638_v0  ;;  %s1907_s21 = scalar_lea.vmem %s2459_s0, %s1523_s12  ;;  %v1644_v9 = vld [vmem:[%s2460_s1 + $0x8] sm:$0xff]   ;;  %v1805_v10 = vmov 65535   ;;  %v1645_v12 = vld [vmem:[%s2460_s1] sm:$0xff]   ;;  %vm734_vm3 = vcmask 523264   ;;  %s1427_s13 = sshll.u32 %s2474_s9, 2  ;;  %vm927_vm4 = vcmask 519168  }
  0x19   : > { %575 = vmatprep.subr.bf16.mxu0 %v1804_v1  ;;  %1557 = vmatprep.subr.bf16.mxu1 %v1804_v1  ;;  %v1650_v6 = vld [vmem:[%s1907_s21 + $0x4] ss:$8 sps:$4 sm:$0xff]   ;;  %v568_v11 = vsel %vm566_vm1, 4294967295, %v1805_v10  ;;  %v1646_v13 = vld [vmem:[%s2460_s1 + $0x48] ss:$0 sps:$4 sm:$0x33]   ;;  %s1983_s22 = scalar_lea.vmem %s2461_s2, %s1427_s13  ;;  %s2388_s13 = scalar_lea.hbm %s2463_s4, %s1519_s29 }
  0x1a   : > { %1470 = vmatprep.mubr.msk.bf16.mxu0 %vm517_vm0, %v1650_v6  ;;  %v1662_v8 = vld [vmem:[%s1907_s21 + $0x84] ss:$8 sps:$4 sm:$0xff]   ;;  %v569_v14 = vsel %vm567_vm2, %v568_v11, 0  ;;  %v1648_v17 = vld [vmem:[%s1907_s21] ss:$8 sps:$4 sm:$0xff]   ;;  %v960_v11 = vlaneseq  ;;  %s1518_s9 = sshll.u32 %s1794_s18, 8 }
  0x1b   : > { %1478 = vmatprep.mubr.msk.bf16.mxu1 %vm517_vm0, %v1662_v8  ;;  %v571_v15 = vand.u32 %v1646_v13, %v569_v14  ;;  %v1647_v16 = vld [vmem:[%s2460_s1 + $0x40] sm:$0xff]   ;;  %v1651_v19 = vld [vmem:[%s1907_s21 + $0x14] ss:$8 sps:$4 sm:$0xff]   ;;  %v1653_v21 = vld [vmem:[%s1907_s21 + $0x10] ss:$8 sps:$4 sm:$0xff]   ;;  %s994_s24 = ssub.s32 512, %s1518_s9 }
  0x1c   : > { %576 = vmatpush1.bf16.msra.mxu0 %v1639_v2  ;;  %1567 = vmatpush1.bf16.msra.mxu1 %v1639_v2  ;;  %v1660_v18 = vld [vmem:[%s1907_s21 + $0x80] ss:$8 sps:$4 sm:$0xff]   ;;  %v1666_v20 = vld [vmem:[%s1907_s21 + $0x94] ss:$8 sps:$4 sm:$0xff]   ;;  %v1668_v22 = vld [vmem:[%s1907_s21 + $0x90] ss:$8 sps:$4 sm:$0xff]  }
  0x1d   : > { %577 = vmatprep.subr.bf16.mxu0 %v1804_v1  ;;  %1558 = vmatprep.subr.bf16.mxu1 %v1804_v1  ;;  %v1654_v23 = vld [vmem:[%s1907_s21 + $0x24] ss:$8 sps:$4 sm:$0xff]   ;;  %v1656_v25 = vld [vmem:[%s1907_s21 + $0x20] ss:$8 sps:$4 sm:$0xff]   ;;  %v1657_v27 = vld [vmem:[%s1907_s21 + $0x34] ss:$8 sps:$4 sm:$0xff]  }
  0x1e   : > { %v1672_v24 = vld [vmem:[%s1907_s21 + $0xa4] ss:$8 sps:$4 sm:$0xff]   ;;  %v1674_v26 = vld [vmem:[%s1907_s21 + $0xa0] ss:$8 sps:$4 sm:$0xff]   ;;  %v1678_v28 = vld [vmem:[%s1907_s21 + $0xb4] ss:$8 sps:$4 sm:$0xff]  }
  0x1f   : > { %v1659_v29 = vld [vmem:[%s1907_s21 + $0x30] ss:$8 sps:$4 sm:$0xff]   ;;  %v1663_v31 = vld [vmem:[%s1907_s21 + $0x44] ss:$8 sps:$4 sm:$0xff]   ;;  %v1665_v33 = vld [vmem:[%s1907_s21 + $0x40] ss:$8 sps:$4 sm:$0xff]  }
  0x20   : > { %578 = vmatpush1.bf16.msra.mxu0 %v1640_v3  ;;  %1568 = vmatpush1.bf16.msra.mxu1 %v1640_v3  ;;  %v1680_v30 = vld [vmem:[%s1907_s21 + $0xb0] ss:$8 sps:$4 sm:$0xff]   ;;  %v1684_v32 = vld [vmem:[%s1907_s21 + $0xc4] ss:$8 sps:$4 sm:$0xff]   ;;  %v1686_v34 = vld [vmem:[%s1907_s21 + $0xc0] ss:$8 sps:$4 sm:$0xff]  }
  0x21   : > { %579 = vmatprep.subr.bf16.mxu0 %v1804_v1  ;;  %1559 = vmatprep.subr.bf16.mxu1 %v1804_v1  ;;  %v1669_v35 = vld [vmem:[%s1907_s21 + $0x54] ss:$8 sps:$4 sm:$0xff]   ;;  %v1671_v37 = vld [vmem:[%s1907_s21 + $0x50] ss:$8 sps:$4 sm:$0xff]   ;;  %v1675_v39 = vld [vmem:[%s1907_s21 + $0x64] ss:$8 sps:$4 sm:$0xff]  }
  0x22   : > { %v1687_v36 = vld [vmem:[%s1907_s21 + $0xd4] ss:$8 sps:$4 sm:$0xff]   ;;  %v1689_v38 = vld [vmem:[%s1907_s21 + $0xd0] ss:$8 sps:$4 sm:$0xff]   ;;  %v1690_v40 = vld [vmem:[%s1907_s21 + $0xe4] ss:$8 sps:$4 sm:$0xff]  }
  0x23   : > { %v1677_v41 = vld [vmem:[%s1907_s21 + $0x60] ss:$8 sps:$4 sm:$0xff]   ;;  %v1681_v43 = vld [vmem:[%s1907_s21 + $0x74] ss:$8 sps:$4 sm:$0xff]   ;;  %v1683_v45 = vld [vmem:[%s1907_s21 + $0x70] ss:$8 sps:$4 sm:$0xff]  }
  0x24   : > { %580 = vmatpush1.bf16.msra.mxu0 %v1641_v4  ;;  %1569 = vmatpush1.bf16.msra.mxu1 %v1641_v4  ;;  %v1692_v42 = vld [vmem:[%s1907_s21 + $0xe0] ss:$8 sps:$4 sm:$0xff]   ;;  %v1693_v44 = vld [vmem:[%s1907_s21 + $0xf4] ss:$8 sps:$4 sm:$0xff]   ;;  %v1695_v46 = vld [vmem:[%s1907_s21 + $0xf0] ss:$8 sps:$4 sm:$0xff]  }
  0x25   : > { %581 = vmatprep.subr.bf16.mxu0 %v1804_v1  ;;  %1560 = vmatprep.subr.bf16.mxu1 %v1804_v1  ;;  %s1696_s21 = scalar_lea.vmem %s2382_s5, 16 }
  0x26   : > { %p1697_p12 = scmp.ne.s32.totalorder %s2382_s5, %s1696_s21 }
  0x28   : > { %582 = vmatpush1.bf16.msra.mxu0 %v1642_v5  ;;  %1570 = vmatpush1.bf16.msra.mxu1 %v1642_v5  ;;  %p1698_p13 = pnand %p1697_p12, %p1873_p4 }
  0x29   : > { %583 = vmatprep.subr.bf16.mxu0 %v1804_v1  ;;  %1561 = vmatprep.subr.bf16.mxu1 %v1804_v1 }
  0x2a   : > { %p1699_p0 = pneg %p1698_p13 }
  0x2c   : > { %584 = vmatpush1.bf16.msra.mxu0 %v1643_v7  ;;  %1571 = vmatpush1.bf16.msra.mxu1 %v1643_v7 }
  0x2d   : > { %585 = vmatprep.subr.bf16.mxu0 %v1804_v1  ;;  %1562 = vmatprep.subr.bf16.mxu1 %v1804_v1 }
  0x30   : > { %586 = vmatpush1.bf16.msra.mxu0 %v1644_v9  ;;  %1572 = vmatpush1.bf16.msra.mxu1 %v1644_v9 }
  0x31   : > { %587 = vmatprep.subr.bf16.mxu0 %v1804_v1  ;;  %1563 = vmatprep.subr.bf16.mxu1 %v1804_v1 }
  0x34   : > { %588 = vmatpush1.bf16.msra.mxu0 %v1645_v12  ;;  %1573 = vmatpush1.bf16.msra.mxu1 %v1645_v12 }
  0x35   : > { %601 = vmatprep.subr.bf16.mxu0 %v1804_v1  ;;  %1564 = vmatprep.subr.bf16.mxu1 %v1804_v1 }
  0x38   : > { %602 = vmatpush2.bf16.msra.mxu0 %v571_v15  ;;  %1574 = vmatpush2.bf16.msra.mxu1 %v571_v15 }
  0x39   : > { %603 = vmatprep.subr.bf16.mxu0 %v1804_v1  ;;  %1565 = vmatprep.subr.bf16.mxu1 %v1804_v1 }
  0x3c   : > { %604 = vmatpush2.bf16.msra.mxu0 %v1647_v16  ;;  %1575 = vmatpush2.bf16.msra.mxu1 %v1647_v16 }
  0x3f   : > { %606 = vmatmul.mubr.bf16.vlgmr.msra.gmra.mxu0 %v1648_v17  ;;  %670 = vmatmul.mubr.bf16.vlgmr.msra.gmra.mxu1 %v1660_v18 }
  0x40   : > { %1471 = vmatprep.mubr.msk.bf16.mxu0 %vm517_vm0, %v1651_v19  ;;  %1479 = vmatprep.mubr.msk.bf16.mxu1 %vm517_vm0, %v1666_v20  ;;  %v2032_v20 = vshrl.u32 %v960_v11, 7 }
  0x42   : > { %v968_v11 = vadd.s32 56, %v2032_v20 }
  0x47   : > { %614 = vmatmul.mubr.bf16.gmra.mxu0 %v1653_v21  ;;  %678 = vmatmul.mubr.bf16.gmra.mxu1 %v1668_v22 }
  0x48   : > { %1472 = vmatprep.mubr.msk.bf16.mxu0 %vm517_vm0, %v1654_v23  ;;  %1480 = vmatprep.mubr.msk.bf16.mxu1 %vm517_vm0, %v1672_v24 }
  0x4f   : > { %622 = vmatmul.mubr.bf16.gmra.mxu0 %v1656_v25  ;;  %686 = vmatmul.mubr.bf16.gmra.mxu1 %v1674_v26  ;;  %v962_v25 = vadd.s32 8, %v2032_v20 }
  0x50   : > { %1473 = vmatprep.mubr.msk.bf16.mxu0 %vm517_vm0, %v1657_v27  ;;  %1481 = vmatprep.mubr.msk.bf16.mxu1 %vm517_vm0, %v1678_v28 }
  0x57   : > { %630 = vmatmul.mubr.bf16.gmra.mxu0 %v1659_v29  ;;  %694 = vmatmul.mubr.bf16.gmra.mxu1 %v1680_v30 }
  0x58   : > { %1474 = vmatprep.mubr.msk.bf16.mxu0 %vm517_vm0, %v1663_v31  ;;  %1482 = vmatprep.mubr.msk.bf16.mxu1 %vm517_vm0, %v1684_v32  ;;  %v2053_v31 = vstv %s994_s24  ;;  %v963_v32 = vadd.s32 16, %v2032_v20 }
  0x59   : > { %vm997_vm5 = vcmp.lt.s32.totalorder %v962_v25, %v2053_v31  ;;  %vm996_vm6 = vcmp.lt.s32.totalorder %v2032_v20, %v2053_v31  ;;  %vm1003_vm12 = vcmp.lt.s32.totalorder %v968_v11, %v2053_v31 }
  0x5a   : > { %vm998_vm7 = vcmp.lt.s32.totalorder %v963_v32, %v2053_v31 }
  0x5f   : > { %638 = vmatmul.mubr.bf16.gmra.mxu0 %v1665_v33  ;;  %702 = vmatmul.mubr.bf16.gmra.mxu1 %v1686_v34 }
  0x60   : > { %1475 = vmatprep.mubr.msk.bf16.mxu0 %vm517_vm0, %v1669_v35  ;;  %1483 = vmatprep.mubr.msk.bf16.mxu1 %vm517_vm0, %v1687_v36  ;;  %v964_v36 = vadd.s32 24, %v2032_v20 }
  0x62   : > { %vm999_vm8 = vcmp.lt.s32.totalorder %v964_v36, %v2053_v31  ;;  %v970_v36 = vadd.s32 72, %v2032_v20 }
  0x64   : > { %vm1005_vm14 = vcmp.lt.s32.totalorder %v970_v36, %v2053_v31 }
  0x67   : > { %646 = vmatmul.mubr.bf16.gmra.mxu0 %v1671_v37  ;;  %710 = vmatmul.mubr.bf16.gmra.mxu1 %v1689_v38 }
  0x68   : > { %1476 = vmatprep.mubr.msk.bf16.mxu0 %vm517_vm0, %v1675_v39  ;;  %1484 = vmatprep.mubr.msk.bf16.mxu1 %vm517_vm0, %v1690_v40 }
  0x6f   : > { %654 = vmatmul.mubr.bf16.gmra.mxu0 %v1677_v41  ;;  %718 = vmatmul.mubr.bf16.gmra.mxu1 %v1692_v42 }
  0x70   : > { %1477 = vmatprep.mubr.msk.bf16.mxu0 %vm517_vm0, %v1681_v43  ;;  %1485 = vmatprep.mubr.msk.bf16.mxu1 %vm517_vm0, %v1693_v44 }
  0x77   : > { %662 = vmatmul.mubr.bf16.gmra.mxu0 %v1683_v45  ;;  %726 = vmatmul.mubr.bf16.gmra.mxu1 %v1695_v46  ;;  %v965_v46 = vadd.s32 32, %v2032_v20 }
  0x79   : > { %vm1000_vm9 = vcmp.lt.s32.totalorder %v965_v46, %v2053_v31 }
  0xff   : > { %v607_v47 = vpop.f32.mrf.mxu0  ;;  %v671_v48 = vpop.f32.mrf.mxu1 }
 0x100   : > { %735 = vst.msk [vmem:[#allocation2] sm:$0xff] %vm734_vm3, %v607_v47  ;;  %751 = vst.msk [vmem:[#allocation2 + $0x80] sm:$0xff] %vm734_vm3, %v671_v48  ;;  %v966_v48 = vadd.s32 40, %v2032_v20 }
 0x101   : > { %v609_v49 = vpop.f32.mrf.mxu0  ;;  %v673_v50 = vpop.f32.mrf.mxu1 }
 0x102   : > { %vm1001_vm10 = vcmp.lt.s32.totalorder %v966_v48, %v2053_v31 }
 0x103   : > { %v610_v51 = vpop.f32.mrf.mxu0  ;;  %v674_v52 = vpop.f32.mrf.mxu1 }
 0x104   : > { %736 = vst.msk [vmem:[#allocation2 + $0x8] sm:$0xff] %vm734_vm3, %v610_v51  ;;  %752 = vst.msk [vmem:[#allocation2 + $0x88] sm:$0xff] %vm734_vm3, %v674_v52 }
 0x105   : > { %v612_v53 = vpop.f32.mrf.mxu0  ;;  %v676_v54 = vpop.f32.mrf.mxu1 }
 0x107   : > { %v1985_v55 = vld [vmem:[#allocation2] sm:$0xff]  ;;  %v615_v56 = vpop.f32.mrf.mxu0  ;;  %v679_v58 = vpop.f32.mrf.mxu1 }
 0x108   : > { %v1987_v57 = vld [vmem:[#allocation2 + $0x80] sm:$0xff]  ;;  %v1524_v59 = vpack.c.bf16 %v1985_v55, %v1985_v55  ;;  %737 = vst.msk [vmem:[#allocation2 + $0x10] sm:$0xff] %vm734_vm3, %v615_v56  ;;  %753 = vst.msk [vmem:[#allocation2 + $0x90] sm:$0xff] %vm734_vm3, %v679_v58  ;;  %v1028_v47 = vsel %vm996_vm6, %v1985_v55, 0.0  ;;  %v967_v58 = vadd.s32 48, %v2032_v20 }
 0x109   : > { %v1540_v60 = vpack.c.bf16 %v1987_v57, %v1987_v57  ;;  %v617_v61 = vpop.f32.mrf.mxu0  ;;  %v681_v62 = vpop.f32.mrf.mxu1 }
 0x10a   : > { %928 = vst.msk [vmem:[%s1983_s22] sm:$0xf] %vm927_vm4, %v1524_v59  ;;  %v1131_v61 = vmul.f32 %v1028_v47, %v1028_v47  ;;  %vm1002_vm11 = vcmp.lt.s32.totalorder %v967_v58, %v2053_v31  ;;  %v972_v58 = vadd.s32 88, %v2032_v20 }
 0x10b   : > { %944 = vst.msk [vmem:[%s1983_s22 + $0x40] sm:$0xf] %vm927_vm4, %v1540_v60  ;;  %v1999_v63 = vld [vmem:[#allocation2 + $0x8] sm:$0xff]  ;;  %v618_v0 = vpop.f32.mrf.mxu0  ;;  %v682_v2 = vpop.f32.mrf.mxu1 }
 0x10c   : > { %v2001_v1 = vld [vmem:[#allocation2 + $0x88] sm:$0xff]  ;;  %v1525_v3 = vpack.c.bf16 %v1999_v63, %v1999_v63  ;;  %738 = vst.msk [vmem:[#allocation2 + $0x18] sm:$0xff] %vm734_vm3, %v618_v0  ;;  %754 = vst.msk [vmem:[#allocation2 + $0x98] sm:$0xff] %vm734_vm3, %v682_v2  ;;  %v1029_v42 = vsel %vm997_vm5, %v1999_v63, 0.0  ;;  %vm1007_vm0 = vcmp.lt.s32.totalorder %v972_v58, %v2053_v31 }
 0x10d   : > { %v1541_v4 = vpack.c.bf16 %v2001_v1, %v2001_v1  ;;  %v620_v5 = vpop.f32.mrf.mxu0  ;;  %v684_v6 = vpop.f32.mrf.mxu1  ;;  %v1132_v53 = vmul.f32 %v1029_v42, %v1029_v42 }
 0x10e   : > { %929 = vst.msk [vmem:[%s1983_s22 + $0x4] sm:$0xf] %vm927_vm4, %v1525_v3  ;;  %v1061_v5 = vsel %vm734_vm3, %v1029_v42, 0.0 }
 0x10f   : > { %945 = vst.msk [vmem:[%s1983_s22 + $0x44] sm:$0xf] %vm927_vm4, %v1541_v4  ;;  %v2013_v7 = vld [vmem:[#allocation2 + $0x10] sm:$0xff]  ;;  %v623_v8 = vpop.f32.mrf.mxu0  ;;  %v687_v10 = vpop.f32.mrf.mxu1  ;;  %v1164_v6 = vsel %vm734_vm3, %v1132_v53, 0.0 }
 0x110   : > { %v2015_v9 = vld [vmem:[#allocation2 + $0x90] sm:$0xff]  ;;  %v1526_v12 = vpack.c.bf16 %v2013_v7, %v2013_v7  ;;  %739 = vst.msk [vmem:[#allocation2 + $0x20] sm:$0xff] %vm734_vm3, %v623_v8  ;;  %755 = vst.msk [vmem:[#allocation2 + $0xa0] sm:$0xff] %vm734_vm3, %v687_v10  ;;  %v1030_v54 = vsel %vm998_vm7, %v2013_v7, 0.0 }
 0x111   : > { %v1542_v13 = vpack.c.bf16 %v2015_v9, %v2015_v9  ;;  %v625_v14 = vpop.f32.mrf.mxu0  ;;  %v689_v15 = vpop.f32.mrf.mxu1  ;;  %v1133_v62 = vmul.f32 %v1030_v54, %v1030_v54 }
 0x112   : > { %930 = vst.msk [vmem:[%s1983_s22 + $0x8] sm:$0xf] %vm927_vm4, %v1526_v12  ;;  %v2121_v12 = vadd.s32 64, %v2032_v20  ;;  %v1060_v15 = vsel %vm734_vm3, %v1028_v47, 0.0 }
 0x113   : > { %946 = vst.msk [vmem:[%s1983_s22 + $0x48] sm:$0xf] %vm927_vm4, %v1542_v13  ;;  %v2028_v16 = vld [vmem:[#allocation2 + $0x18] sm:$0xff]  ;;  %v626_v17 = vpop.f32.mrf.mxu0  ;;  %v690_v19 = vpop.f32.mrf.mxu1 }
 0x114   : > { %v2030_v18 = vld [vmem:[#allocation2 + $0x98] sm:$0xff]  ;;  %v1527_v21 = vpack.c.bf16 %v2028_v16, %v2028_v16  ;;  %740 = vst.msk [vmem:[#allocation2 + $0x28] sm:$0xff] %vm734_vm3, %v626_v17  ;;  %756 = vst.msk [vmem:[#allocation2 + $0xa8] sm:$0xff] %vm734_vm3, %v690_v19  ;;  %v1031_v63 = vsel %vm999_vm8, %v2028_v16, 0.0  ;;  %v1163_v16 = vsel %vm734_vm3, %v1131_v61, 0.0  ;;  %v1063_v17 = vsel %vm734_vm3, %v1030_v54, 0.0 }
 0x115   : > { %v628_v22 = vpop.f32.mrf.mxu0  ;;  %v1543_v23 = vpack.c.bf16 %v2030_v18, %v2030_v18  ;;  %v692_v24 = vpop.f32.mrf.mxu1  ;;  %v1134_v19 = vmul.f32 %v1031_v63, %v1031_v63  ;;  %vm1004_vm13 = vcmp.lt.s32.totalorder %v2121_v12, %v2053_v31 }
 0x116   : > { %931 = vst.msk [vmem:[%s1983_s22 + $0xc] sm:$0xf] %vm927_vm4, %v1527_v21  ;;  %v1062_v21 = vadd.f32 %v1061_v5, %v1060_v15  ;;  %v1165_v22 = vadd.f32 %v1164_v6, %v1163_v16  ;;  %v1065_v24 = vsel %vm734_vm3, %v1031_v63, 0.0  ;;  %v973_v16 = vadd.s32 96, %v2032_v20 }
 0x117   : > { %v2043_v26 = vld [vmem:[#allocation2 + $0x20] sm:$0xff]  ;;  %v631_v27 = vpop.f32.mrf.mxu0  ;;  %947 = vst.msk [vmem:[%s1983_s22 + $0x4c] sm:$0xf] %vm927_vm4, %v1543_v23  ;;  %v695_v29 = vpop.f32.mrf.mxu1  ;;  %v1166_v23 = vsel %vm734_vm3, %v1133_v62, 0.0  ;;  %v1168_v42 = vsel %vm734_vm3, %v1134_v19, 0.0 }
 0x118   : > { %v2047_v28 = vld [vmem:[#allocation2 + $0xa0] sm:$0xff]  ;;  %v1528_v30 = vpack.c.bf16 %v2043_v26, %v2043_v26  ;;  %741 = vst.msk [vmem:[#allocation2 + $0x30] sm:$0xff] %vm734_vm3, %v631_v27  ;;  %757 = vst.msk [vmem:[#allocation2 + $0xb0] sm:$0xff] %vm734_vm3, %v695_v29  ;;  %v1032_v10 = vsel %vm1000_vm9, %v2043_v26, 0.0  ;;  %vm1008_vm1 = vcmp.lt.s32.totalorder %v973_v16, %v2053_v31 }
 0x119   : > { %v633_v33 = vpop.f32.mrf.mxu0  ;;  %v1544_v34 = vpack.c.bf16 %v2047_v28, %v2047_v28  ;;  %v697_v35 = vpop.f32.mrf.mxu1 }
 0x11a   : > { %932 = vst.msk [vmem:[%s1983_s22 + $0x10] sm:$0xf] %vm927_vm4, %v1528_v30  ;;  %v1135_v30 = vmul.f32 %v1032_v10, %v1032_v10  ;;  %v1064_v35 = vadd.f32 %v1063_v17, %v1062_v21 }
 0x11b   : > { %v2062_v37 = vld [vmem:[#allocation2 + $0x28] sm:$0xff]  ;;  %v634_v38 = vpop.f32.mrf.mxu0  ;;  %948 = vst.msk [vmem:[%s1983_s22 + $0x50] sm:$0xf] %vm927_vm4, %v1544_v34  ;;  %v698_v40 = vpop.f32.mrf.mxu1 }
 0x11c   : > { %v2066_v39 = vld [vmem:[#allocation2 + $0xa8] sm:$0xff]  ;;  %v1529_v41 = vpack.c.bf16 %v2062_v37, %v2062_v37  ;;  %742 = vst.msk [vmem:[#allocation2 + $0x38] sm:$0xff] %vm734_vm3, %v634_v38  ;;  %758 = vst.msk [vmem:[#allocation2 + $0xb8] sm:$0xff] %vm734_vm3, %v698_v40  ;;  %v1033_v32 = vsel %vm1001_vm10, %v2062_v37, 0.0  ;;  %v971_v37 = vadd.s32 80, %v2032_v20  ;;  %v1170_v53 = vsel %vm734_vm3, %v1135_v30, 0.0 }
 0x11d   : > { %v636_v43 = vpop.f32.mrf.mxu0  ;;  %v1545_v44 = vpack.c.bf16 %v2066_v39, %v2066_v39  ;;  %v700_v45 = vpop.f32.mrf.mxu1  ;;  %v1069_v62 = vsel %vm734_vm3, %v1033_v32, 0.0 }
 0x11e   : > { %933 = vst.msk [vmem:[%s1983_s22 + $0x14] sm:$0xf] %vm927_vm4, %v1529_v41  ;;  %v1167_v41 = vadd.f32 %v1166_v23, %v1165_v22  ;;  %v1066_v43 = vadd.f32 %v1065_v24, %v1064_v35  ;;  %v1136_v45 = vmul.f32 %v1033_v32, %v1033_v32  ;;  %vm1006_vm15 = vcmp.lt.s32.totalorder %v971_v37, %v2053_v31 }
 0x11f   : > { %v2084_v49 = vld [vmem:[#allocation2 + $0x30] sm:$0xff]  ;;  %v639_v50 = vpop.f32.mrf.mxu0  ;;  %949 = vst.msk [vmem:[%s1983_s22 + $0x54] sm:$0xf] %vm927_vm4, %v1545_v44  ;;  %v703_v52 = vpop.f32.mrf.mxu1  ;;  %v1067_v44 = vsel %vm734_vm3, %v1032_v10, 0.0 }
 0x120   : > { %v2088_v51 = vld [vmem:[#allocation2 + $0xb0] sm:$0xff]  ;;  %v1530_v55 = vpack.c.bf16 %v2084_v49, %v2084_v49  ;;  %743 = vst.msk [vmem:[#allocation2 + $0x40] sm:$0xff] %vm734_vm3, %v639_v50  ;;  %759 = vst.msk [vmem:[#allocation2 + $0xc0] sm:$0xff] %vm734_vm3, %v703_v52  ;;  %v1034_v46 = vsel %vm1002_vm11, %v2084_v49, 0.0  ;;  %v1068_v61 = vadd.f32 %v1067_v44, %v1066_v43  ;;  %v974_v43 = vadd.s32 104, %v2032_v20 }
 0x121   : > { %v1546_v56 = vpack.c.bf16 %v2088_v51, %v2088_v51  ;;  %v641_v59 = vpop.f32.mrf.mxu0  ;;  %v705_v60 = vpop.f32.mrf.mxu1  ;;  %v1137_v63 = vmul.f32 %v1034_v46, %v1034_v46  ;;  %v1071_v11 = vsel %vm734_vm3, %v1034_v46, 0.0 }
 0x122   : > { %934 = vst.msk [vmem:[%s1983_s22 + $0x18] sm:$0xf] %vm927_vm4, %v1530_v55  ;;  %v1070_v15 = vadd.f32 %v1069_v62, %v1068_v61  ;;  %vm1009_vm2 = vcmp.lt.s32.totalorder %v974_v43, %v2053_v31 }
 0x123   : > { %950 = vst.msk [vmem:[%s1983_s22 + $0x58] sm:$0xf] %vm927_vm4, %v1546_v56  ;;  %v774_v0 = vld [vmem:[#allocation2 + $0x38] sm:$0xff]  ;;  %v642_v2 = vpop.f32.mrf.mxu0  ;;  %v706_v4 = vpop.f32.mrf.mxu1  ;;  %v1169_v56 = vadd.f32 %v1168_v42, %v1167_v41  ;;  %v1174_v22 = vsel %vm734_vm3, %v1137_v63, 0.0 }
 0x124   : > { %v2107_v3 = vld [vmem:[#allocation2 + $0xb8] sm:$0xff]  ;;  %v1531_v7 = vpack.c.bf16 %v774_v0, %v774_v0  ;;  %744 = vst.msk [vmem:[#allocation2 + $0x48] sm:$0xff] %vm734_vm3, %v642_v2  ;;  %760 = vst.msk [vmem:[#allocation2 + $0xc8] sm:$0xff] %vm734_vm3, %v706_v4  ;;  %v1035_v54 = vsel %vm1003_vm12, %v774_v0, 0.0  ;;  %v1172_v2 = vsel %vm734_vm3, %v1136_v45, 0.0 }
 0x125   : > { %v1547_v8 = vpack.c.bf16 %v2107_v3, %v2107_v3  ;;  %v644_v13 = vpop.f32.mrf.mxu0  ;;  %v708_v14 = vpop.f32.mrf.mxu1  ;;  %v1171_v0 = vadd.f32 %v1170_v53, %v1169_v56  ;;  %v1138_v4 = vmul.f32 %v1035_v54, %v1035_v54  ;;  %v1073_v23 = vsel %vm734_vm3, %v1035_v54, 0.0 }
 0x126   : > { %935 = vst.msk [vmem:[%s1983_s22 + $0x1c] sm:$0xf] %vm927_vm4, %v1531_v7 }
 0x127   : > { %951 = vst.msk [vmem:[%s1983_s22 + $0x5c] sm:$0xf] %vm927_vm4, %v1547_v8  ;;  %v775_v25 = vld [vmem:[#allocation2 + $0x40] sm:$0xff]  ;;  %v647_v26 = vpop.f32.mrf.mxu0  ;;  %v711_v27 = vpop.f32.mrf.mxu1  ;;  %v1173_v21 = vadd.f32 %v1172_v2, %v1171_v0  ;;  %v977_v2 = vadd.s32 128, %v2032_v20 }
 0x128   : > { %v2132_v29 = vld [vmem:[#allocation2 + $0xc0] sm:$0xff]  ;;  %v1532_v33 = vpack.c.bf16 %v775_v25, %v775_v25  ;;  %745 = vst.msk [vmem:[#allocation2 + $0x50] sm:$0xff] %vm734_vm3, %v647_v26  ;;  %761 = vst.msk [vmem:[#allocation2 + $0xd0] sm:$0xff] %vm734_vm3, %v711_v27  ;;  %v1036_v5 = vsel %vm1004_vm13, %v775_v25, 0.0  ;;  %v1072_v25 = vadd.f32 %v1071_v11, %v1070_v15  ;;  %v1176_v26 = vsel %vm734_vm3, %v1138_v4, 0.0 }
 0x129   : > { %v1548_v34 = vpack.c.bf16 %v2132_v29, %v2132_v29  ;;  %v649_v38 = vpop.f32.mrf.mxu0  ;;  %v713_v40 = vpop.f32.mrf.mxu1  ;;  %v1139_v24 = vmul.f32 %v1036_v5, %v1036_v5  ;;  %v1075_v36 = vsel %vm734_vm3, %v1036_v5, 0.0  ;;  %v1175_v42 = vadd.f32 %v1174_v22, %v1173_v21 }
 0x12a   : > { %936 = vst.msk [vmem:[%s1983_s22 + $0x20] sm:$0xf] %vm927_vm4, %v1532_v33  ;;  %v1074_v37 = vadd.f32 %v1073_v23, %v1072_v25  ;;  %vm1012_vm6 = vcmp.lt.s32.totalorder %v977_v2, %v2053_v31 }
 0x12b   : > { %952 = vst.msk [vmem:[%s1983_s22 + $0x60] sm:$0xf] %vm927_vm4, %v1548_v34  ;;  %v776_v47 = vld [vmem:[#allocation2 + $0x48] sm:$0xff]  ;;  %v650_v48 = vpop.f32.mrf.mxu0  ;;  %v714_v50 = vpop.f32.mrf.mxu1  ;;  %v1178_v46 = vsel %vm734_vm3, %v1139_v24, 0.0  ;;  %v1177_v53 = vadd.f32 %v1176_v26, %v1175_v42 }
 0x12c   : > { %v2155_v52 = vld [vmem:[#allocation2 + $0xc8] sm:$0xff]  ;;  %v1533_v55 = vpack.c.bf16 %v776_v47, %v776_v47  ;;  %746 = vst.msk [vmem:[#allocation2 + $0x58] sm:$0xff] %vm734_vm3, %v650_v48  ;;  %762 = vst.msk [vmem:[#allocation2 + $0xd8] sm:$0xff] %vm734_vm3, %v714_v50  ;;  %v1037_v13 = vsel %vm1005_vm14, %v776_v47, 0.0  ;;  %v2212_v50 = vadd.s32 112, %v2032_v20  ;;  %v1076_v54 = vadd.f32 %v1075_v36, %v1074_v37 }
 0x12d   : > { %v1549_v49 = vpack.c.bf16 %v2155_v52, %v2155_v52  ;;  %v652_v59 = vpop.f32.mrf.mxu0  ;;  %v716_v60 = vpop.f32.mrf.mxu1  ;;  %v1140_v27 = vmul.f32 %v1037_v13, %v1037_v13  ;;  %v1077_v47 = vsel %vm734_vm3, %v1037_v13, 0.0  ;;  %v1179_v4 = vadd.f32 %v1178_v46, %v1177_v53 }
 0x12e   : > { %937 = vst.msk [vmem:[%s1983_s22 + $0x24] sm:$0xf] %vm927_vm4, %v1533_v55  ;;  %v1078_v5 = vadd.f32 %v1077_v47, %v1076_v54  ;;  %vm1010_vm5 = vcmp.lt.s32.totalorder %v2212_v50, %v2053_v31 }
 0x12f   : > { %953 = vst.msk [vmem:[%s1983_s22 + $0x64] sm:$0xf] %vm927_vm4, %v1549_v49  ;;  %v777_v6 = vld [vmem:[#allocation2 + $0x50] sm:$0xff]  ;;  %v655_v7 = vpop.f32.mrf.mxu0  ;;  %v719_v8 = vpop.f32.mrf.mxu1  ;;  %v1180_v55 = vsel %vm734_vm3, %v1140_v27, 0.0 }
 0x130   : > { %v2176_v10 = vld [vmem:[#allocation2 + $0xd0] sm:$0xff]  ;;  %v1534_v14 = vpack.c.bf16 %v777_v6, %v777_v6  ;;  %747 = vst.msk [vmem:[#allocation2 + $0x60] sm:$0xff] %vm734_vm3, %v655_v7  ;;  %763 = vst.msk [vmem:[#allocation2 + $0xe0] sm:$0xff] %vm734_vm3, %v719_v8  ;;  %v1038_v30 = vsel %vm1006_vm15, %v777_v6, 0.0  ;;  %v978_v8 = vadd.s32 136, %v2032_v20 }
 0x131   : > { %v1550_v12 = vpack.c.bf16 %v2176_v10, %v2176_v10  ;;  %v657_v17 = vpop.f32.mrf.mxu0  ;;  %v721_v19 = vpop.f32.mrf.mxu1  ;;  %v1141_v48 = vmul.f32 %v1038_v30, %v1038_v30  ;;  %v1079_v61 = vsel %vm734_vm3, %v1038_v30, 0.0 }
 0x132   : > { %938 = vst.msk [vmem:[%s1983_s22 + $0x28] sm:$0xf] %vm927_vm4, %v1534_v14  ;;  %v1080_v15 = vadd.f32 %v1079_v61, %v1078_v5  ;;  %vm1013_vm7 = vcmp.lt.s32.totalorder %v978_v8, %v2053_v31  ;;  %v982_v61 = vadd.s32 168, %v2032_v20 }
 0x133   : > { %954 = vst.msk [vmem:[%s1983_s22 + $0x68] sm:$0xf] %vm927_vm4, %v1550_v12  ;;  %v778_v32 = vld [vmem:[#allocation2 + $0x58] sm:$0xff]  ;;  %v658_v33 = vpop.f32.mrf.mxu0  ;;  %v722_v34 = vpop.f32.mrf.mxu1  ;;  %v1182_v11 = vsel %vm734_vm3, %v1141_v48, 0.0  ;;  %v1181_v12 = vadd.f32 %v1180_v55, %v1179_v4  ;;  %v1045_v50 = vsel %vm1013_vm7, %v2001_v1, 0.0 }
 0x134   : > { %v2196_v35 = vld [vmem:[#allocation2 + $0xd8] sm:$0xff]  ;;  %v1535_v38 = vpack.c.bf16 %v778_v32, %v778_v32  ;;  %v1039_v40 = vsel %vm1007_vm0, %v778_v32, 0.0  ;;  %748 = vst.msk [vmem:[#allocation2 + $0x68] sm:$0xff] %vm734_vm3, %v658_v33  ;;  %764 = vst.msk [vmem:[#allocation2 + $0xe8] sm:$0xff] %vm734_vm3, %v722_v34  ;;  %v976_v33 = vadd.s32 120, %v2032_v20  ;;  %vm1017_vm12 = vcmp.lt.s32.totalorder %v982_v61, %v2053_v31 }
 0x135   : > { %v1551_v41 = vpack.c.bf16 %v2196_v35, %v2196_v35  ;;  %v660_v44 = vpop.f32.mrf.mxu0  ;;  %v724_v45 = vpop.f32.mrf.mxu1  ;;  %v1142_v49 = vmul.f32 %v1039_v40, %v1039_v40  ;;  %v1081_v13 = vsel %vm734_vm3, %v1039_v40, 0.0  ;;  %v1183_v27 = vadd.f32 %v1182_v11, %v1181_v12 }
 0x136   : > { %939 = vst.msk [vmem:[%s1983_s22 + $0x2c] sm:$0xf] %vm927_vm4, %v1535_v38  ;;  %v1082_v30 = vadd.f32 %v1081_v13, %v1080_v15  ;;  %v979_v38 = vadd.s32 144, %v2032_v20  ;;  %vm1011_vm8 = vcmp.lt.s32.totalorder %v976_v33, %v2053_v31  ;;  %v1148_v15 = vmul.f32 %v1045_v50, %v1045_v50 }
 0x137   : > { %955 = vst.msk [vmem:[%s1983_s22 + $0x6c] sm:$0xf] %vm927_vm4, %v1551_v41  ;;  %v779_v56 = vld [vmem:[#allocation2 + $0x60] sm:$0xff]  ;;  %v663_v58 = vpop.f32.mrf.mxu0  ;;  %v727_v59 = vpop.f32.mrf.mxu1  ;;  %v1184_v16 = vsel %vm734_vm3, %v1142_v49, 0.0  ;;  %v980_v41 = vadd.s32 152, %v2032_v20  ;;  %v985_v33 = vadd.s32 192, %v2032_v20 }
 0x138   : > { %v2217_v60 = vld [vmem:[#allocation2 + $0xe0] sm:$0xff]  ;;  %v1536_v62 = vpack.c.bf16 %v779_v56, %v779_v56  ;;  %v1040_v63 = vsel %vm1008_vm1, %v779_v56, 0.0  ;;  %749 = vst.msk [vmem:[#allocation2 + $0x70] sm:$0xff] %vm734_vm3, %v663_v58  ;;  %765 = vst.msk [vmem:[#allocation2 + $0xf0] sm:$0xff] %vm734_vm3, %v727_v59  ;;  %v1185_v42 = vadd.f32 %v1184_v16, %v1183_v27  ;;  %v1044_v56 = vsel %vm1012_vm6, %v1987_v57, 0.0 }
 0x139   : > { %v1552_v0 = vpack.c.bf16 %v2217_v60, %v2217_v60  ;;  %v665_v6 = vpop.f32.mrf.mxu0  ;;  %v729_v7 = vpop.f32.mrf.mxu1  ;;  %v1143_v14 = vmul.f32 %v1040_v63, %v1040_v63  ;;  %v1083_v23 = vsel %vm734_vm3, %v1040_v63, 0.0  ;;  %vm1014_vm9 = vcmp.lt.s32.totalorder %v979_v38, %v2053_v31 }
 0x13a   : > { %940 = vst.msk [vmem:[%s1983_s22 + $0x30] sm:$0xf] %vm927_vm4, %v1536_v62  ;;  %v1084_v37 = vadd.f32 %v1083_v23, %v1082_v30  ;;  %v981_v58 = vadd.s32 160, %v2032_v20  ;;  %v1147_v7 = vmul.f32 %v1044_v56, %v1044_v56  ;;  %vm1015_vm10 = vcmp.lt.s32.totalorder %v980_v41, %v2053_v31 }
 0x13b   : > { %956 = vst.msk [vmem:[%s1983_s22 + $0x70] sm:$0xf] %vm927_vm4, %v1552_v0  ;;  %v780_v17 = vld [vmem:[#allocation2 + $0x68] sm:$0xff]  ;;  %v666_v19 = vpop.f32.mrf.mxu0  ;;  %v730_v21 = vpop.f32.mrf.mxu1  ;;  %v1186_v40 = vsel %vm734_vm3, %v1143_v14, 0.0  ;;  %v1046_v11 = vsel %vm1014_vm9, %v2015_v9, 0.0  ;;  %v1091_v12 = vsel %vm734_vm3, %v1044_v56, 0.0  ;;  %vm1020_vm14 = vcmp.lt.s32.totalorder %v985_v33, %v2053_v31 }
 0x13c   : > { %v2238_v22 = vld [vmem:[#allocation2 + $0xe8] sm:$0xff]  ;;  %v1537_v24 = vpack.c.bf16 %v780_v17, %v780_v17  ;;  %v1041_v25 = vsel %vm1009_vm2, %v780_v17, 0.0  ;;  %750 = vst.msk [vmem:[#allocation2 + $0x78] sm:$0xff] %vm734_vm3, %v666_v19  ;;  %766 = vst.msk [vmem:[#allocation2 + $0xf8] sm:$0xff] %vm734_vm3, %v730_v21  ;;  %v1187_v54 = vadd.f32 %v1186_v40, %v1185_v42  ;;  %vm1016_vm11 = vcmp.lt.s32.totalorder %v981_v58, %v2053_v31 }
 0x13d   : > { %v1553_v26 = vpack.c.bf16 %v2238_v22, %v2238_v22  ;;  %v1144_v32 = vmul.f32 %v1041_v25, %v1041_v25  ;;  %v668_v34 = vpop.f32.mrf.mxu0  ;;  %v732_v36 = vpop.f32.mrf.mxu1  ;;  %v1085_v43 = vsel %vm734_vm3, %v1041_v25, 0.0  ;;  %v983_v16 = vadd.s32 176, %v2032_v20 }
 0x13e   : > { %941 = vst.msk [vmem:[%s1983_s22 + $0x34] sm:$0xf] %vm927_vm4, %v1537_v24  ;;  %v1086_v59 = vadd.f32 %v1085_v43, %v1084_v37  ;;  %v1047_v19 = vsel %vm1015_vm10, %v2030_v18, 0.0  ;;  %v1194_v23 = vsel %vm734_vm3, %v1147_v7, 0.0  ;;  %v1093_v24 = vsel %vm734_vm3, %v1045_v50, 0.0 }
 0x13f   : > { %957 = vst.msk [vmem:[%s1983_s22 + $0x74] sm:$0xf] %vm927_vm4, %v1553_v26  ;;  %v781_v44 = vld [vmem:[#allocation2 + $0x70] sm:$0xff]  ;;  %v1188_v46 = vsel %vm734_vm3, %v1144_v32, 0.0  ;;  %v1149_v25 = vmul.f32 %v1046_v11, %v1046_v11  ;;  %v984_v26 = vadd.s32 184, %v2032_v20  ;;  %v1048_v27 = vsel %vm1016_vm11, %v2047_v28, 0.0 }
 0x140   : > { %v2258_v45 = vld [vmem:[#allocation2 + $0xf0] sm:$0xff]  ;;  %v1538_v47 = vpack.c.bf16 %v781_v44, %v781_v44  ;;  %v1042_v48 = vsel %vm1010_vm5, %v781_v44, 0.0  ;;  %v1189_v62 = vadd.f32 %v1188_v46, %v1187_v54  ;;  %v1196_v18 = vsel %vm734_vm3, %v1148_v15, 0.0 }
 0x141   : > { %v1554_v53 = vpack.c.bf16 %v2258_v45, %v2258_v45  ;;  %v1087_v55 = vsel %vm734_vm3, %v1042_v48, 0.0  ;;  %v1145_v49 = vmul.f32 %v1042_v48, %v1042_v48  ;;  %v1095_v34 = vsel %vm734_vm3, %v1046_v11, 0.0 }
 0x142   : > { %942 = vst.msk [vmem:[%s1983_s22 + $0x38] sm:$0xf] %vm927_vm4, %v1538_v47  ;;  %v1088_v2 = vadd.f32 %v1087_v55, %v1086_v59  ;;  %v1150_v36 = vmul.f32 %v1047_v19, %v1047_v19  ;;  %v1049_v38 = vsel %vm1017_vm12, %v2066_v39, 0.0  ;;  %v986_v41 = vadd.s32 200, %v2032_v20 }
 0x143   : > { %958 = vst.msk [vmem:[%s1983_s22 + $0x78] sm:$0xf] %vm927_vm4, %v1554_v53  ;;  %v1190_v63 = vsel %vm734_vm3, %v1145_v49, 0.0  ;;  %v782_v57 = vld [vmem:[#allocation2 + $0x78] sm:$0xff]  ;;  %v1198_v37 = vsel %vm734_vm3, %v1149_v25, 0.0  ;;  %v1097_v28 = vsel %vm734_vm3, %v1047_v19, 0.0  ;;  %v1151_v43 = vmul.f32 %v1048_v27, %v1048_v27 }
 0x144   : > { %v2282_v0 = vld [vmem:[#allocation2 + $0xf8] sm:$0xff]  ;;  %v1539_v4 = vpack.c.bf16 %v782_v57, %v782_v57  ;;  %v1043_v5 = vsel %vm1011_vm8, %v782_v57, 0.0  ;;  %v1191_v13 = vadd.f32 %v1190_v63, %v1189_v62  ;;  %vm1019_vm13 = vcmp.lt.s32.totalorder %v984_v26, %v2053_v31 }
 0x145   : > { %v1555_v6 = vpack.c.bf16 %v2282_v0, %v2282_v0  ;;  %v1089_v1 = vsel %vm734_vm3, %v1043_v5, 0.0  ;;  %v1146_v8 = vmul.f32 %v1043_v5, %v1043_v5  ;;  %v1200_v48 = vsel %vm734_vm3, %v1150_v36, 0.0 }
 0x146   : > { %943 = vst.msk [vmem:[%s1983_s22 + $0x3c] sm:$0xf] %vm927_vm4, %v1539_v4  ;;  %v1090_v14 = vadd.f32 %v1089_v1, %v1088_v2  ;;  %v1099_v39 = vsel %vm734_vm3, %v1048_v27, 0.0  ;;  %v1152_v53 = vmul.f32 %v1049_v38, %v1049_v38  ;;  %v987_v54 = vadd.s32 208, %v2032_v20 }
 0x147   : > { %959 = vst.msk [vmem:[%s1983_s22 + $0x7c] sm:$0xf] %vm927_vm4, %v1555_v6  ;;  %v1192_v17 = vsel %vm734_vm3, %v1146_v8, 0.0  ;;  %vm1018_vm4 = vcmp.lt.s32.totalorder %v983_v16, %v2053_v31  ;;  %vm1021_vm15 = vcmp.lt.s32.totalorder %v986_v41, %v2053_v31  ;;  %v1051_v55 = vsel %vm1019_vm13, %v2107_v3, 0.0  ;;  %s1806_s22 = smov [#allocation3]  }
 0x148   : > { %v1092_v9 = vadd.f32 %v1091_v12, %v1090_v14  ;;  %v1193_v21 = vadd.f32 %v1192_v17, %v1191_v13  ;;  %v1050_v44 = vsel %vm1018_vm4, %v2088_v51, 0.0  ;;  %v1202_v58 = vsel %vm734_vm3, %v1151_v43, 0.0  ;;  %s1700_s9 = sshll.u32 %s1806_s22, 4  ;;  %s1701_s9 = int_to_ptr.vmem [resolvable:$false] %s1700_s9 }
 0x149   : > { %v1101_v51 = vsel %vm734_vm3, %v1049_v38, 0.0  ;;  %v1153_v59 = vmul.f32 %v1050_v44, %v1050_v44  ;;  %v988_v50 = vadd.s32 216, %v2032_v20  ;;  %v989_v61 = vadd.s32 224, %v2032_v20  ;;  %s1702_s24 = scalar_lea.vmem %s1701_s9, 32  ;;  %p1703_p1 = scmp.lt.s32.totalorder %s2382_s5, %s1701_s9 }
 0x14a   : > { %v1094_v30 = vadd.f32 %v1093_v24, %v1092_v9  ;;  %v1195_v32 = vadd.f32 %v1194_v23, %v1193_v21  ;;  %v1052_v62 = vsel %vm1020_vm14, %v2132_v29, 0.0  ;;  %vm1022_vm0 = vcmp.lt.s32.totalorder %v987_v54, %v2053_v31  ;;  %p1704_p2 = scmp.lt.s32.totalorder %s1702_s24, %s1696_s21 }
 0x14b   : > { %v1103_v3 = vsel %vm734_vm3, %v1050_v44, 0.0  ;;  %v1154_v2 = vmul.f32 %v1051_v55, %v1051_v55  ;;  %v1204_v4 = vsel %vm734_vm3, %v1152_v53, 0.0  ;;  %v990_v5 = vadd.s32 232, %v2032_v20 }
 0x14c   : > { %v1197_v40 = vadd.f32 %v1196_v18, %v1195_v32  ;;  %v1096_v42 = vadd.f32 %v1095_v34, %v1094_v30  ;;  %v1053_v6 = vsel %vm1021_vm15, %v2155_v52, 0.0  ;;  %vm1023_vm1 = vcmp.lt.s32.totalorder %v988_v50, %v2053_v31  ;;  %p1705_p3 = por %p1704_p2, %p1703_p1 }
 0x14d   : > { %v1105_v29 = vsel %vm734_vm3, %v1051_v55, 0.0  ;;  %v1155_v8 = vmul.f32 %v1052_v62, %v1052_v62  ;;  %v1206_v11 = vsel %vm734_vm3, %v1153_v59, 0.0  ;;  %v991_v13 = vadd.s32 240, %v2032_v20 }
 0x14e   : > { %v1098_v46 = vadd.f32 %v1097_v28, %v1096_v42  ;;  %v1199_v47 = vadd.f32 %v1198_v37, %v1197_v40  ;;  %v1054_v14 = vsel %vm1022_vm0, %v2176_v10, 0.0  ;;  %vm1024_vm2 = vcmp.lt.s32.totalorder %v989_v61, %v2053_v31  ;;  %p1706_p5 = pnand %p1705_p3, %p1699_p0 }
 0x14f   : > { %v1107_v16 = vsel %vm734_vm3, %v1052_v62, 0.0  ;;  %v1156_v52 = vmul.f32 %v1053_v6, %v1053_v6  ;;  %v1208_v17 = vsel %vm734_vm3, %v1154_v2, 0.0  ;;  %v992_v19 = vadd.s32 248, %v2032_v20 }
 0x150   : > { %v1100_v49 = vadd.f32 %v1099_v39, %v1098_v46  ;;  %v1201_v56 = vadd.f32 %v1200_v48, %v1199_v47  ;;  %v1055_v9 = vsel %vm1023_vm1, %v2196_v35, 0.0  ;;  %vm1025_vm5 = vcmp.lt.s32.totalorder %v990_v5, %v2053_v31 }
 0x151   : > { %v1109_v24 = vsel %vm734_vm3, %v1053_v6, 0.0  ;;  %v1157_v10 = vmul.f32 %v1054_v14, %v1054_v14  ;;  %v1210_v25 = vsel %vm734_vm3, %v1155_v8, 0.0  ;;  %v1056_v26 = vsel %vm1024_vm2, %v2217_v60, 0.0 }
 0x152   : > { %v1102_v63 = vadd.f32 %v1101_v51, %v1100_v49  ;;  %v1203_v57 = vadd.f32 %v1202_v58, %v1201_v56  ;;  %vm1026_vm6 = vcmp.lt.s32.totalorder %v991_v13, %v2053_v31  ;;  %v1111_v32 = vsel %vm734_vm3, %v1054_v14, 0.0 }
 0x153   : > { %v1158_v20 = vmul.f32 %v1055_v9, %v1055_v9  ;;  %v1212_v35 = vsel %vm734_vm3, %v1156_v52, 0.0  ;;  %v1057_v33 = vsel %vm1025_vm5, %v2238_v22, 0.0  ;;  %vm1027_vm7 = vcmp.lt.s32.totalorder %v992_v19, %v2053_v31 }
 0x154   : > { %v1104_v7 = vadd.f32 %v1103_v3, %v1102_v63  ;;  %v1205_v1 = vadd.f32 %v1204_v4, %v1203_v57  ;;  %v1113_v36 = vsel %vm734_vm3, %v1055_v9, 0.0  ;;  %v1159_v38 = vmul.f32 %v1056_v26, %v1056_v26 }
 0x155   : > { %v1214_v60 = vsel %vm734_vm3, %v1157_v10, 0.0  ;;  %v1058_v40 = vsel %vm1026_vm6, %v2258_v45, 0.0  ;;  %v1115_v37 = vsel %vm734_vm3, %v1056_v26, 0.0  ;;  %v1160_v28 = vmul.f32 %v1057_v33, %v1057_v33 }
 0x156   : > { %v1106_v12 = vadd.f32 %v1105_v29, %v1104_v7  ;;  %v1207_v15 = vadd.f32 %v1206_v11, %v1205_v1  ;;  %v1216_v43 = vsel %vm734_vm3, %v1158_v20, 0.0  ;;  %v1059_v22 = vsel %vm1027_vm7, %v2282_v0, 0.0 }
 0x157   : > { %v1117_v31 = vsel %vm734_vm3, %v1057_v33, 0.0  ;;  %v1161_v47 = vmul.f32 %v1058_v40, %v1058_v40  ;;  %v1218_v48 = vsel %vm734_vm3, %v1159_v38, 0.0  ;;  %v1119_v45 = vsel %vm734_vm3, %v1058_v40, 0.0 }
 0x158   : > { %v1108_v21 = vadd.f32 %v1107_v16, %v1106_v12  ;;  %v1209_v23 = vadd.f32 %v1208_v17, %v1207_v15  ;;  %v1162_v54 = vmul.f32 %v1059_v22, %v1059_v22  ;;  %v1220_v55 = vsel %vm734_vm3, %v1160_v28, 0.0 }
 0x159   : > { %v1121_v0 = vsel %vm734_vm3, %v1059_v22, 0.0  ;;  %v1222_v58 = vsel %vm734_vm3, %v1161_v47, 0.0 }
 0x15a   : > { %v1110_v27 = vadd.f32 %v1109_v24, %v1108_v21  ;;  %v1211_v30 = vadd.f32 %v1210_v25, %v1209_v23  ;;  %v1224_v50 = vsel %vm734_vm3, %v1162_v54, 0.0  ;;  %vm1129_vm3 = vcmask 516096  }
 0x15c   : > { %v1112_v18 = vadd.f32 %v1111_v32, %v1110_v27  ;;  %v1213_v34 = vadd.f32 %v1212_v35, %v1211_v30 }
 0x15e   : > { %v1114_v41 = vadd.f32 %v1113_v36, %v1112_v18  ;;  %v1215_v42 = vadd.f32 %v1214_v60, %v1213_v34 }
 0x160   : > { %v1116_v44 = vadd.f32 %v1115_v37, %v1114_v41  ;;  %v1217_v46 = vadd.f32 %v1216_v43, %v1215_v42 }
 0x162   : > { %v1118_v39 = vadd.f32 %v1117_v31, %v1116_v44  ;;  %v1219_v53 = vadd.f32 %v1218_v48, %v1217_v46 }
 0x164   : > { %v1120_v49 = vadd.f32 %v1119_v45, %v1118_v39  ;;  %v1221_v56 = vadd.f32 %v1220_v55, %v1219_v53 }
 0x166   : > { %v1122_v51 = vadd.f32 %v1121_v0, %v1120_v49  ;;  %v1223_v59 = vadd.f32 %v1222_v58, %v1221_v56 }
 0x168   : > { %v1123_v61 = vrot.slane %v1122_v51, 4  ;;  %v1225_v62 = vadd.f32 %v1224_v50, %v1223_v59 }
 0x16a   : > { %v1124_v63 = vadd.f32 %v1123_v61, %v1122_v51  ;;  %v1226_v57 = vrot.slane %v1225_v62, 4 }
 0x16c   : > { %v1125_v3 = vrot.slane %v1124_v63, 2  ;;  %v1227_v2 = vadd.f32 %v1226_v57, %v1225_v62 }
 0x16e   : > { %v1126_v4 = vadd.f32 %v1125_v3, %v1124_v63  ;;  %v1228_v5 = vrot.slane %v1227_v2, 2 }
 0x170   : > { %v1127_v6 = vrot.slane %v1126_v4, 1  ;;  %v1229_v7 = vadd.f32 %v1228_v5, %v1227_v2 }
 0x172   : > { %v1128_v1 = vadd.f32 %v1127_v6, %v1126_v4  ;;  %v1230_v29 = vrot.slane %v1229_v7, 1 }
 0x174   : > { %1130 = vst.msk [vmem:[%s237_s30] sm:$0x1] %vm1129_vm3, %v1128_v1  ;;  %v1231_v8 = vadd.f32 %v1230_v29, %v1229_v7 }
 0x175   : > { %1709 = shalt.err (!%p1706_p5)
}
 0x176   : > { %s1710_s29 = scalar_lea.hbm %s2380_s11, 16  ;;  %s1714_s10 = scalar_lea.hbm %s2462_s3, 32 }
 0x177   : > { %p1711_p6 = scmp.ne.s32.totalorder %s2380_s11, %s1710_s29  ;;  %p1715_p10 = scmp.lt.s32.totalorder %s2380_s11, %s2462_s3 }
 0x178   : > { %p1716_p11 = scmp.lt.s32.totalorder %s1714_s10, %s1710_s29 }
 0x179   : > { %p1712_p7 = pnand %p1711_p6, %p1873_p4 }
 0x17a   : > { %p1717_p12 = por %p1716_p11, %p1715_p10 }
 0x17b   : > { %p1713_p9 = pneg %p1712_p7 }
 0x17d   : > { %p1718_p13 = pnand %p1717_p12, %p1713_p9 }
 0x17f   : > { %1721 = shalt.err (!%p1718_p13)
}
 0x180   : > { %1576 = dma.vmem_to_hbm [thread:$0]  (%p1873_p4), %s2382_s5, 16, %s2380_s11, %s1242_s14   ;;  %1232 = vst.msk [vmem:[%s243_s6] sm:$0x1] %vm1129_vm3, %v1231_v8 }
 0x181   : > { %s1246_s21 = scalar_lea.sflag [#allocation6], %s2370_s26  ;;  %s1722_s22 = scalar_lea.vmem %s2390_s7, 16 }
 0x182   : > { %p1723_p0 = scmp.ne.s32.totalorder %s2390_s7, %s1722_s22  ;;  %s1807_s9 = smov [#allocation5]  }
 0x183   : > { %s1726_s24 = sshll.u32 %s1807_s9, 4  ;;  %s1727_s24 = int_to_ptr.vmem [resolvable:$false] %s1726_s24 }
 0x184   : > { %p1724_p1 = pnand %p1723_p0, %p1873_p4  ;;  %s1728_s29 = scalar_lea.vmem %s1727_s24, 32 }
 0x185   : > { %p1729_p3 = scmp.lt.s32.totalorder %s2390_s7, %s1727_s24  ;;  %p1730_p5 = scmp.lt.s32.totalorder %s1728_s29, %s1722_s22 }
 0x186   : > { %p1725_p2 = pneg %p1724_p1 }
 0x187   : > { %p1731_p6 = por %p1730_p5, %p1729_p3 }
 0x189   : > { %p1732_p7 = pnand %p1731_p6, %p1725_p2 }
 0x18b   : > { %1735 = shalt.err (!%p1732_p7)
}
 0x18c   : > { %s1736_s5 = scalar_lea.hbm %s2388_s13, 16  ;;  %s1740_s11 = scalar_lea.hbm %s2463_s4, 32 }
 0x18d   : > { %p1737_p9 = scmp.ne.s32.totalorder %s2388_s13, %s1736_s5  ;;  %p1741_p12 = scmp.lt.s32.totalorder %s2388_s13, %s2463_s4 }
 0x18e   : > { %p1742_p13 = scmp.lt.s32.totalorder %s1740_s11, %s1736_s5 }
 0x18f   : > { %p1738_p10 = pnand %p1737_p9, %p1873_p4 }
 0x190   : > { %p1743_p0 = por %p1742_p13, %p1741_p12 }
 0x191   : > { %p1739_p11 = pneg %p1738_p10 }
 0x193   : > { %p1744_p1 = pnand %p1743_p0, %p1739_p11 }
 0x195   : > { %1747 = shalt.err (!%p1744_p1)
}
 0x196   : > { %1577 = dma.vmem_to_hbm [thread:$0]  (%p1873_p4), %s2390_s7, 16, %s2388_s13, %s1246_s21  }
 0x197 PF: > { %p1587_p2 = scmp.ge.s32.totalorder %s1802_s20, 2  ;;  %s1300_s8 = sand.u32 1, %s1782_s15  }
 0x198   : > { %s1301_s10 = scalar_lea.sflag [#allocation4], %s1300_s8 }
 0x199   : > { %p1581_p3 = pnand %p1587_p2, %p1880_p8 }
 0x19b   : > { %p1582_p5 = pneg %p1581_p3 }
 0x19d   : > { %1773 = dma.done.wait (%p1582_p5), %s1301_s10, 16  }
 0x19e   : > { %1775 = vsyncadd (%p1582_p5), %s1301_s10, 4294967280  ;;  %s1309_s18 = scalar_lea.sflag [#allocation6], %s1300_s8 }
 0x19f   : > { %1777 = dma.done.wait (%p1582_p5), %s1309_s18, 16  }
 0x1a0   : > { %1779 = vsyncadd (%p1582_p5), %s1309_s18, 4294967280  ;;  %s21_s20 = sadd.s32 1, %s1802_s20   ;;  %s2466_s15 = smov %s1786_s16 }
 0x1a1   : > { %p18_p6 = scmp.ge.s32.totalorder %s21_s20, 4   ;;  %s2467_s16 = smov %s1790_s17 }
 0x1a2   : > { %s2468_s17 = smov %s1886_s28  ;;  %s2469_s18 = smov %s1798_s19 }
 0x1a3   : > { %s2470_s19 = smov %s2472_s23  ;;  %20 = sbr.rel (!%p18_p6) target bundleno = 6 (0x6), region = 95 }
 0x1a8   :  { %1313 = vsyncpa [#allocation4], 1 }
 0x1a9   :  { %1315 = vsyncpa [#allocation4 + $0x1], 1 }
 0x1aa   :  { %1316 = vsyncpa [#allocation6], 1 }
 0x1ab   :  { %1318 = vsyncpa [#allocation6 + $0x1], 1 }

</bundles_post_ra>
